<compile_context>
chip_gen: v7x
topology: tpu7x:2x2x1
jax: 0.10.0
libtpu: 0.0.40
codegen_flags: <defaults>
</compile_context>

<pallas_src>
import jax
import jax.numpy as jnp
from jax import lax
from jax.experimental import pallas as pl
from jax.experimental.pallas import tpu as pltpu


def lstm_tagger_kernel(docs_ref, emb_ref, wih_t_ref, whh_t_ref, b_ref,
                       wout_t_ref, bout_ref, out_ref, x_scratch):
    """Per-document forward: gather -> LSTM recurrence -> linear -> log_softmax.

    docs_ref  : (N, T)   int32 token ids (SMEM, scalar-prefetched)
    emb_ref   : (V, E)   embedding table (VMEM)
    wih_t_ref : (E, 4H)  input->gate weights, transposed, gates packed [i|f|g|o]
    whh_t_ref : (H, 4H)  hidden->gate weights, transposed, packed
    b_ref     : (1, 4H)  b_ih + b_hh, packed
    wout_t_ref: (H, L)   hidden2label weight, transposed
    bout_ref  : (1, L)   hidden2label bias
    out_ref   : (1,1,L)  log_softmax output block for this document
    x_scratch : (T, E)   VMEM scratch for the gathered embeddings
    """
    n = pl.program_id(0)
    T = x_scratch.shape[0]
    H = whh_t_ref.shape[0]
    V = emb_ref.shape[0]
    L = bout_ref.shape[1]

    # Fused embedding gather: clamp ids (no VMEM OOB check exists) and write
    # each row straight into the scratch tile (no concatenate materialization).
    for t in range(T):
        tok = jnp.clip(docs_ref[n, t], 0, V - 1)
        x_scratch[pl.ds(t, 1), :] = emb_ref[pl.ds(tok, 1), :]

    # Input projection for all timesteps in one MXU matmul (hoisted out of the
    # recurrence): x_t @ W_ih^T + (b_ih + b_hh).
    xg = jnp.dot(x_scratch[...], wih_t_ref[...],
                 preferred_element_type=jnp.float32) + b_ref[...]       # (T, 4H)

    # Hoisted lane-mask constants for the combined sigmoid/tanh activation:
    #   i/f/o lanes: sigmoid(x) = 0.5 * (tanh(0.5 x) + 1)
    #   g lanes    : tanh(x)
    lane = lax.broadcasted_iota(jnp.int32, (1, 4 * H), 1)
    is_g = (lane >= 2 * H) & (lane < 3 * H)
    pre_scale = jnp.where(is_g, 1.0, 0.5)     # multiply argument
    post_scale = jnp.where(is_g, 1.0, 0.5)    # scale tanh result
    post_shift = jnp.where(is_g, 0.0, 0.5)    # shift tanh result

    h = jnp.zeros((1, H), jnp.float32)
    c = jnp.zeros((1, H), jnp.float32)

    # Fully unrolled recurrence (T is a small static Python int): every slice
    # is static and all steps are visible to the scheduler.
    # TODO(synk): explicit MXU weight-register residency for W_hh
    # (pltpu.matmul_push_rhs / matmul_acc_lhs / matmul_pop, with MRB in-place
    # accumulation on v7x) is not used; jnp.dot is kept for portability across
    # v5e/v6e/v7x MXU shapes and result-path (MRF vs MRB) differences.
    for t in range(T):
        gates = xg[t:t + 1, :] + jnp.dot(
            h, whh_t_ref[...], preferred_element_type=jnp.float32)     # (1, 4H)
        th = jnp.tanh(gates * pre_scale)          # single EUP push, 128 lanes
        act = th * post_scale + post_shift        # sigmoid for i/f/o, tanh for g
        i = act[:, 0 * H:1 * H]
        f = act[:, 1 * H:2 * H]
        g = act[:, 2 * H:3 * H]
        o = act[:, 3 * H:4 * H]
        c = f * c + i * g
        h = o * jnp.tanh(c)

    # hidden2label + numerically-stable log_softmax.
    logits = jnp.dot(h, wout_t_ref[...],
                     preferred_element_type=jnp.float32) + bout_ref[...]
    m = jnp.max(logits, axis=-1, keepdims=True)
    shifted = logits - m
    lse = jnp.log(jnp.sum(jnp.exp(shifted), axis=-1, keepdims=True))
    out_ref[...] = jnp.reshape(shifted - lse, (1, 1, L))


def prepare_params(params):
    """One-time prep: transpose weights into the packed [i|f|g|o] lane layout.

    PyTorch stacks the gates along rows of W_ih/W_hh/b, so a plain transpose
    already yields gate g in lanes [g*H, (g+1)*H); with H=32, 4H = 128 = one
    full lane width (no padding needed anywhere).
    """
    return {
        "embedding": params["embedding"].astype(jnp.float32),          # (V, E)
        "wih_t": params["w_ih"].T.astype(jnp.float32),                 # (E, 4H)
        "whh_t": params["w_hh"].T.astype(jnp.float32),                 # (H, 4H)
        "b": (params["b_ih"] + params["b_hh"]).astype(jnp.float32)[None, :],
        "wout_t": params["w_out"].T.astype(jnp.float32),               # (H, L)
        "bout": params["b_out"].astype(jnp.float32)[None, :],          # (1, L)
    }


@jax.jit
def lstm_tagger_forward(docs, prepped):
    """docs: (T,) or (N, T) int32 token ids.  Returns (1, L) or (N, L) log-probs.

    Each document uses a fresh zero hidden state (init_hidden()).
    """
    docs2d = docs if docs.ndim == 2 else docs[None, :]
    docs2d = docs2d.astype(jnp.int32)
    N, T = docs2d.shape

    emb = prepped["embedding"]
    wih_t = prepped["wih_t"]
    whh_t = prepped["whh_t"]
    b = prepped["b"]
    wout_t = prepped["wout_t"]
    bout = prepped["bout"]
    E = emb.shape[1]
    L = bout.shape[1]

    def const_spec(shape):
        # Full-array VMEM block with a constant index_map: DMA'd once, stays
        # resident across the (parallel) document grid.
        return pl.BlockSpec(shape, lambda n, docs_ref, _s=shape: (0,) * len(_s))

    grid_spec = pltpu.PrefetchScalarGridSpec(
        num_scalar_prefetch=1,                 # docs -> SMEM
        grid=(N,),
        in_specs=[
            const_spec(emb.shape),
            const_spec(wih_t.shape),
            const_spec(whh_t.shape),
            const_spec(b.shape),
            const_spec(wout_t.shape),
            const_spec(bout.shape),
        ],
        out_specs=pl.BlockSpec((1, 1, L), lambda n, docs_ref: (n, 0, 0)),
        scratch_shapes=[pltpu.VMEM((T, E), jnp.float32)],
    )

    out = pl.pallas_call(
        lstm_tagger_kernel,
        out_shape=jax.ShapeDtypeStruct((N, 1, L), jnp.float32),
        grid_spec=grid_spec,
        compiler_params=pltpu.CompilerParams(
            dimension_semantics=("parallel",)),
    )(docs2d, emb, wih_t, whh_t, b, wout_t, bout)

    out = out.reshape(N, L)
    return out if docs.ndim == 2 else out[:1]


def _reference_forward(docs, params):
    """Pure-JAX reference mirroring the PyTorch forward (batch=1 path)."""
    emb = params["embedding"][docs]
    H = params["w_hh"].shape[1]
    b = params["b_ih"] + params["b_hh"]

    def step(carry, x_t):
        h, c = carry
        gates = x_t @ params["w_ih"].T + h @ params["w_hh"].T + b
        i = jax.nn.sigmoid(gates[0:H])
        f = jax.nn.sigmoid(gates[H:2 * H])
        g = jnp.tanh(gates[2 * H:3 * H])
        o = jax.nn.sigmoid(gates[3 * H:4 * H])
        c_new = f * c + i * g
        h_new = o * jnp.tanh(c_new)
        return (h_new, c_new), None

    (h_last, _), _ = lax.scan(step, (jnp.zeros(H), jnp.zeros(H)), emb)
    logits = h_last @ params["w_out"].T + params["b_out"]
    return jax.nn.log_softmax(logits)[None, :]


def init_params(key, embedding_dim, hidden_dim, vocab_size, label_size):
    ks = jax.random.split(key, 7)
    k_lstm = 1.0 / jnp.sqrt(hidden_dim)
    k_lin = 1.0 / jnp.sqrt(hidden_dim)
    return {
        "embedding": jax.random.normal(ks[0], (vocab_size, embedding_dim),
                                       jnp.float32),
        "w_ih": jax.random.uniform(ks[1], (4 * hidden_dim, embedding_dim),
                                   jnp.float32, -k_lstm, k_lstm),
        "w_hh": jax.random.uniform(ks[2], (4 * hidden_dim, hidden_dim),
                                   jnp.float32, -k_lstm, k_lstm),
        "b_ih": jax.random.uniform(ks[3], (4 * hidden_dim,), jnp.float32,
                                   -k_lstm, k_lstm),
        "b_hh": jax.random.uniform(ks[4], (4 * hidden_dim,), jnp.float32,
                                   -k_lstm, k_lstm),
        "w_out": jax.random.uniform(ks[5], (label_size, hidden_dim),
                                    jnp.float32, -k_lin, k_lin),
        "b_out": jax.random.uniform(ks[6], (label_size,), jnp.float32,
                                    -k_lin, k_lin),
    }


if __name__ == "__main__":
    EMBED_DIM, HIDDEN_DIM, VOCAB_SIZE, LABEL_SIZE = 16, 32, 50, 4
    SEQ_LEN, N_DOCS = 8, 4

    key = jax.random.PRNGKey(0)
    k_params, k_docs = jax.random.split(key)
    params = init_params(k_params, EMBED_DIM, HIDDEN_DIM, VOCAB_SIZE,
                         LABEL_SIZE)
    docs_batch = jax.random.randint(k_docs, (N_DOCS, SEQ_LEN), 0, VOCAB_SIZE,
                                    jnp.int32)

    prepped = prepare_params(params)                  # one-time weight prep

    # Batched path: one pallas_call, documents on a "parallel" grid axis.
    out_batch = jax.block_until_ready(lstm_tagger_forward(docs_batch, prepped))
    assert out_batch.shape == (N_DOCS, LABEL_SIZE)

    # Single-document path (matches the module's (1, label_size) output).
    out_single = jax.block_until_ready(
        lstm_tagger_forward(docs_batch[0], prepped))
    assert out_single.shape == (1, LABEL_SIZE)

    # Correctness vs. pure-JAX reference (fresh zero hidden per document).
    refs = jnp.concatenate(
        [_reference_forward(docs_batch[i], params) for i in range(N_DOCS)],
        axis=0)
    assert jnp.allclose(out_batch, refs, atol=1e-4, rtol=1e-4), (out_batch, refs)
    assert jnp.allclose(out_single, refs[:1], atol=1e-4, rtol=1e-4)

    print("KERNEL_OK")
</pallas_src>

<mosaic_0001>
module attributes {stable_mosaic.version = 11 : i64} {
  func.func @lstm_tagger_kernel(%arg0: i32, %arg1: memref<4x8xi32, #tpu.memory_space<smem>>, %arg2: memref<50x16xf32, #tpu.memory_space<vmem>>, %arg3: memref<16x128xf32, #tpu.memory_space<vmem>>, %arg4: memref<32x128xf32, #tpu.memory_space<vmem>>, %arg5: memref<1x128xf32, #tpu.memory_space<vmem>>, %arg6: memref<32x4xf32, #tpu.memory_space<vmem>>, %arg7: memref<1x4xf32, #tpu.memory_space<vmem>>, %arg8: memref<1x1x4xf32, #tpu.memory_space<vmem>>, %arg9: memref<8x16xf32, #tpu.memory_space<vmem>>) attributes {dimension_semantics = [#tpu.dimension_semantics<parallel>], iteration_bounds = array<i64: 4>, scalar_prefetch = 1 : i64, scratch_operands = 1 : i64, tpu.core_type = #tpu.core_type<tc>, window_params = [{pipeline_mode = #tpu.pipeline_mode<synchronous>, transform_indices = @transform_0, window_bounds = array<i64: 50, 16>}, {pipeline_mode = #tpu.pipeline_mode<synchronous>, transform_indices = @transform_1, window_bounds = array<i64: 16, 128>}, {pipeline_mode = #tpu.pipeline_mode<synchronous>, transform_indices = @transform_2, window_bounds = array<i64: 32, 128>}, {pipeline_mode = #tpu.pipeline_mode<synchronous>, transform_indices = @transform_3, window_bounds = array<i64: 1, 128>}, {pipeline_mode = #tpu.pipeline_mode<synchronous>, transform_indices = @transform_4, window_bounds = array<i64: 32, 4>}, {pipeline_mode = #tpu.pipeline_mode<synchronous>, transform_indices = @transform_5, window_bounds = array<i64: 1, 4>}, {transform_indices = @transform_6, window_bounds = array<i64: 1, 1, 4>}]} {
    %0 = arith.index_cast %arg0 : i32 to index
    %c0 = arith.constant 0 : index
    %1 = memref.load %arg1[%0, %c0] : memref<4x8xi32, #tpu.memory_space<smem>>
    %c0_i32 = arith.constant 0 : i32
    %c49_i32 = arith.constant 49 : i32
    %2 = arith.maxsi %c0_i32, %1 : i32
    %3 = arith.minsi %c49_i32, %2 : i32
    %4 = arith.index_cast %3 : i32 to index
    %c0_0 = arith.constant 0 : index
    %5 = vector.load %arg2[%4, %c0_0] : memref<50x16xf32, #tpu.memory_space<vmem>>, vector<1x16xf32>
    %c0_1 = arith.constant 0 : index
    %c0_2 = arith.constant 0 : index
    %6 = vector.load %arg9[%c0_1, %c0_2] : memref<8x16xf32, #tpu.memory_space<vmem>>, vector<1x16xf32>
    tpu.vector_store %arg9[%c0_1, %c0_2], %5 {strides = array<i32>} : memref<8x16xf32, #tpu.memory_space<vmem>>, vector<1x16xf32>,
    %7 = arith.index_cast %arg0 : i32 to index
    %c1 = arith.constant 1 : index
    %8 = memref.load %arg1[%7, %c1] : memref<4x8xi32, #tpu.memory_space<smem>>
    %c0_i32_3 = arith.constant 0 : i32
    %c49_i32_4 = arith.constant 49 : i32
    %9 = arith.maxsi %c0_i32_3, %8 : i32
    %10 = arith.minsi %c49_i32_4, %9 : i32
    %11 = arith.index_cast %10 : i32 to index
    %c0_5 = arith.constant 0 : index
    %12 = vector.load %arg2[%11, %c0_5] : memref<50x16xf32, #tpu.memory_space<vmem>>, vector<1x16xf32>
    %c1_6 = arith.constant 1 : index
    %c0_7 = arith.constant 0 : index
    %13 = vector.load %arg9[%c1_6, %c0_7] : memref<8x16xf32, #tpu.memory_space<vmem>>, vector<1x16xf32>
    tpu.vector_store %arg9[%c1_6, %c0_7], %12 {strides = array<i32>} : memref<8x16xf32, #tpu.memory_space<vmem>>, vector<1x16xf32>,
    %14 = arith.index_cast %arg0 : i32 to index
    %c2 = arith.constant 2 : index
    %15 = memref.load %arg1[%14, %c2] : memref<4x8xi32, #tpu.memory_space<smem>>
    %c0_i32_8 = arith.constant 0 : i32
    %c49_i32_9 = arith.constant 49 : i32
    %16 = arith.maxsi %c0_i32_8, %15 : i32
    %17 = arith.minsi %c49_i32_9, %16 : i32
    %18 = arith.index_cast %17 : i32 to index
    %c0_10 = arith.constant 0 : index
    %19 = vector.load %arg2[%18, %c0_10] : memref<50x16xf32, #tpu.memory_space<vmem>>, vector<1x16xf32>
    %c2_11 = arith.constant 2 : index
    %c0_12 = arith.constant 0 : index
    %20 = vector.load %arg9[%c2_11, %c0_12] : memref<8x16xf32, #tpu.memory_space<vmem>>, vector<1x16xf32>
    tpu.vector_store %arg9[%c2_11, %c0_12], %19 {strides = array<i32>} : memref<8x16xf32, #tpu.memory_space<vmem>>, vector<1x16xf32>,
    %21 = arith.index_cast %arg0 : i32 to index
    %c3 = arith.constant 3 : index
    %22 = memref.load %arg1[%21, %c3] : memref<4x8xi32, #tpu.memory_space<smem>>
    %c0_i32_13 = arith.constant 0 : i32
    %c49_i32_14 = arith.constant 49 : i32
    %23 = arith.maxsi %c0_i32_13, %22 : i32
    %24 = arith.minsi %c49_i32_14, %23 : i32
    %25 = arith.index_cast %24 : i32 to index
    %c0_15 = arith.constant 0 : index
    %26 = vector.load %arg2[%25, %c0_15] : memref<50x16xf32, #tpu.memory_space<vmem>>, vector<1x16xf32>
    %c3_16 = arith.constant 3 : index
    %c0_17 = arith.constant 0 : index
    %27 = vector.load %arg9[%c3_16, %c0_17] : memref<8x16xf32, #tpu.memory_space<vmem>>, vector<1x16xf32>
    tpu.vector_store %arg9[%c3_16, %c0_17], %26 {strides = array<i32>} : memref<8x16xf32, #tpu.memory_space<vmem>>, vector<1x16xf32>,
    %28 = arith.index_cast %arg0 : i32 to index
    %c4 = arith.constant 4 : index
    %29 = memref.load %arg1[%28, %c4] : memref<4x8xi32, #tpu.memory_space<smem>>
    %c0_i32_18 = arith.constant 0 : i32
    %c49_i32_19 = arith.constant 49 : i32
    %30 = arith.maxsi %c0_i32_18, %29 : i32
    %31 = arith.minsi %c49_i32_19, %30 : i32
    %32 = arith.index_cast %31 : i32 to index
    %c0_20 = arith.constant 0 : index
    %33 = vector.load %arg2[%32, %c0_20] : memref<50x16xf32, #tpu.memory_space<vmem>>, vector<1x16xf32>
    %c4_21 = arith.constant 4 : index
    %c0_22 = arith.constant 0 : index
    %34 = vector.load %arg9[%c4_21, %c0_22] : memref<8x16xf32, #tpu.memory_space<vmem>>, vector<1x16xf32>
    tpu.vector_store %arg9[%c4_21, %c0_22], %33 {strides = array<i32>} : memref<8x16xf32, #tpu.memory_space<vmem>>, vector<1x16xf32>,
    %35 = arith.index_cast %arg0 : i32 to index
    %c5 = arith.constant 5 : index
    %36 = memref.load %arg1[%35, %c5] : memref<4x8xi32, #tpu.memory_space<smem>>
    %c0_i32_23 = arith.constant 0 : i32
    %c49_i32_24 = arith.constant 49 : i32
    %37 = arith.maxsi %c0_i32_23, %36 : i32
    %38 = arith.minsi %c49_i32_24, %37 : i32
    %39 = arith.index_cast %38 : i32 to index
    %c0_25 = arith.constant 0 : index
    %40 = vector.load %arg2[%39, %c0_25] : memref<50x16xf32, #tpu.memory_space<vmem>>, vector<1x16xf32>
    %c5_26 = arith.constant 5 : index
    %c0_27 = arith.constant 0 : index
    %41 = vector.load %arg9[%c5_26, %c0_27] : memref<8x16xf32, #tpu.memory_space<vmem>>, vector<1x16xf32>
    tpu.vector_store %arg9[%c5_26, %c0_27], %40 {strides = array<i32>} : memref<8x16xf32, #tpu.memory_space<vmem>>, vector<1x16xf32>,
    %42 = arith.index_cast %arg0 : i32 to index
    %c6 = arith.constant 6 : index
    %43 = memref.load %arg1[%42, %c6] : memref<4x8xi32, #tpu.memory_space<smem>>
    %c0_i32_28 = arith.constant 0 : i32
    %c49_i32_29 = arith.constant 49 : i32
    %44 = arith.maxsi %c0_i32_28, %43 : i32
    %45 = arith.minsi %c49_i32_29, %44 : i32
    %46 = arith.index_cast %45 : i32 to index
    %c0_30 = arith.constant 0 : index
    %47 = vector.load %arg2[%46, %c0_30] : memref<50x16xf32, #tpu.memory_space<vmem>>, vector<1x16xf32>
    %c6_31 = arith.constant 6 : index
    %c0_32 = arith.constant 0 : index
    %48 = vector.load %arg9[%c6_31, %c0_32] : memref<8x16xf32, #tpu.memory_space<vmem>>, vector<1x16xf32>
    tpu.vector_store %arg9[%c6_31, %c0_32], %47 {strides = array<i32>} : memref<8x16xf32, #tpu.memory_space<vmem>>, vector<1x16xf32>,
    %49 = arith.index_cast %arg0 : i32 to index
    %c7 = arith.constant 7 : index
    %50 = memref.load %arg1[%49, %c7] : memref<4x8xi32, #tpu.memory_space<smem>>
    %c0_i32_33 = arith.constant 0 : i32
    %c49_i32_34 = arith.constant 49 : i32
    %51 = arith.maxsi %c0_i32_33, %50 : i32
    %52 = arith.minsi %c49_i32_34, %51 : i32
    %53 = arith.index_cast %52 : i32 to index
    %c0_35 = arith.constant 0 : index
    %54 = vector.load %arg2[%53, %c0_35] : memref<50x16xf32, #tpu.memory_space<vmem>>, vector<1x16xf32>
    %c7_36 = arith.constant 7 : index
    %c0_37 = arith.constant 0 : index
    %55 = vector.load %arg9[%c7_36, %c0_37] : memref<8x16xf32, #tpu.memory_space<vmem>>, vector<1x16xf32>
    tpu.vector_store %arg9[%c7_36, %c0_37], %54 {strides = array<i32>} : memref<8x16xf32, #tpu.memory_space<vmem>>, vector<1x16xf32>,
    %c0_38 = arith.constant 0 : index
    %c0_39 = arith.constant 0 : index
    %56 = vector.load %arg9[%c0_38, %c0_39] : memref<8x16xf32, #tpu.memory_space<vmem>>, vector<8x16xf32>
    %c0_40 = arith.constant 0 : index
    %c0_41 = arith.constant 0 : index
    %57 = vector.load %arg3[%c0_40, %c0_41] : memref<16x128xf32, #tpu.memory_space<vmem>>, vector<16x128xf32>
    %cst = arith.constant dense<0.000000e+00> : vector<8x128xf32>
    %58 = tpu.matmul %56, %57, %cst {dimension_numbers = #tpu.dot_dimension_numbers<[1], [0], [0], [1], [0, 0, 1, 1], [], []>} : vector<8x16xf32>, vector<16x128xf32>, vector<8x128xf32> -> vector<8x128xf32>
    %c0_42 = arith.constant 0 : index
    %c0_43 = arith.constant 0 : index
    %59 = vector.load %arg5[%c0_42, %c0_43] : memref<1x128xf32, #tpu.memory_space<vmem>>, vector<1x128xf32>
    %60 = vector.broadcast %59 : vector<1x128xf32> to vector<8x128xf32>
    %61 = arith.addf %58, %60 : vector<8x128xf32>
    %62 = tpu.iota {dimensions = array<i32: 1>} : vector<1x128xi32>
    %c64_i32 = arith.constant 64 : i32
    %63 = vector.broadcast %c64_i32 : i32 to vector<1x128xi32>
    %64 = arith.cmpi sge, %62, %63 : vector<1x128xi32>
    %c96_i32 = arith.constant 96 : i32
    %65 = vector.broadcast %c96_i32 : i32 to vector<1x128xi32>
    %66 = arith.cmpi slt, %62, %65 : vector<1x128xi32>
    %67 = arith.andi %64, %66 : vector<1x128xi1>
    %cst_44 = arith.constant 1.000000e+00 : f32
    %cst_45 = arith.constant 5.000000e-01 : f32
    %68 = vector.broadcast %cst_44 : f32 to vector<1x128xf32>
    %69 = vector.broadcast %cst_45 : f32 to vector<1x128xf32>
    %70 = arith.select %67, %68, %69 : vector<1x128xi1>, vector<1x128xf32>
    %cst_46 = arith.constant 1.000000e+00 : f32
    %cst_47 = arith.constant 5.000000e-01 : f32
    %71 = vector.broadcast %cst_46 : f32 to vector<1x128xf32>
    %72 = vector.broadcast %cst_47 : f32 to vector<1x128xf32>
    %73 = arith.select %67, %71, %72 : vector<1x128xi1>, vector<1x128xf32>
    %cst_48 = arith.constant 0.000000e+00 : f32
    %cst_49 = arith.constant 5.000000e-01 : f32
    %74 = vector.broadcast %cst_48 : f32 to vector<1x128xf32>
    %75 = vector.broadcast %cst_49 : f32 to vector<1x128xf32>
    %76 = arith.select %67, %74, %75 : vector<1x128xi1>, vector<1x128xf32>
    %cst_50 = arith.constant 0.000000e+00 : f32
    %77 = vector.broadcast %cst_50 : f32 to vector<1x32xf32>
    %cst_51 = arith.constant 0.000000e+00 : f32
    %78 = vector.broadcast %cst_51 : f32 to vector<1x32xf32>
    %79 = vector.extract_strided_slice %61 {offsets = [0, 0], sizes = [1, 128], strides = [1, 1]} : vector<8x128xf32> to vector<1x128xf32>
    %c0_52 = arith.constant 0 : index
    %c0_53 = arith.constant 0 : index
    %80 = vector.load %arg4[%c0_52, %c0_53] : memref<32x128xf32, #tpu.memory_space<vmem>>, vector<32x128xf32>
    %cst_54 = arith.constant dense<0.000000e+00> : vector<1x128xf32>
    %81 = tpu.matmul %77, %80, %cst_54 {dimension_numbers = #tpu.dot_dimension_numbers<[1], [0], [0], [1], [0, 0, 1, 1], [], []>} : vector<1x32xf32>, vector<32x128xf32>, vector<1x128xf32> -> vector<1x128xf32>
    %82 = arith.addf %79, %81 : vector<1x128xf32>
    %83 = arith.mulf %82, %70 : vector<1x128xf32>
    %84 = math.tanh %83 : vector<1x128xf32>
    %85 = arith.mulf %84, %73 : vector<1x128xf32>
    %86 = arith.addf %85, %76 : vector<1x128xf32>
    %87 = vector.extract_strided_slice %86 {offsets = [0, 0], sizes = [1, 32], strides = [1, 1]} : vector<1x128xf32> to vector<1x32xf32>
    %88 = vector.extract_strided_slice %86 {offsets = [0, 32], sizes = [1, 32], strides = [1, 1]} : vector<1x128xf32> to vector<1x32xf32>
    %89 = vector.extract_strided_slice %86 {offsets = [0, 64], sizes = [1, 32], strides = [1, 1]} : vector<1x128xf32> to vector<1x32xf32>
    %90 = vector.extract_strided_slice %86 {offsets = [0, 96], sizes = [1, 32], strides = [1, 1]} : vector<1x128xf32> to vector<1x32xf32>
    %91 = arith.mulf %88, %78 : vector<1x32xf32>
    %92 = arith.mulf %87, %89 : vector<1x32xf32>
    %93 = arith.addf %91, %92 : vector<1x32xf32>
    %94 = math.tanh %93 : vector<1x32xf32>
    %95 = arith.mulf %90, %94 : vector<1x32xf32>
    %96 = vector.extract_strided_slice %61 {offsets = [1, 0], sizes = [1, 128], strides = [1, 1]} : vector<8x128xf32> to vector<1x128xf32>
    %c0_55 = arith.constant 0 : index
    %c0_56 = arith.constant 0 : index
    %97 = vector.load %arg4[%c0_55, %c0_56] : memref<32x128xf32, #tpu.memory_space<vmem>>, vector<32x128xf32>
    %cst_57 = arith.constant dense<0.000000e+00> : vector<1x128xf32>
    %98 = tpu.matmul %95, %97, %cst_57 {dimension_numbers = #tpu.dot_dimension_numbers<[1], [0], [0], [1], [0, 0, 1, 1], [], []>} : vector<1x32xf32>, vector<32x128xf32>, vector<1x128xf32> -> vector<1x128xf32>
    %99 = arith.addf %96, %98 : vector<1x128xf32>
    %100 = arith.mulf %99, %70 : vector<1x128xf32>
    %101 = math.tanh %100 : vector<1x128xf32>
    %102 = arith.mulf %101, %73 : vector<1x128xf32>
    %103 = arith.addf %102, %76 : vector<1x128xf32>
    %104 = vector.extract_strided_slice %103 {offsets = [0, 0], sizes = [1, 32], strides = [1, 1]} : vector<1x128xf32> to vector<1x32xf32>
    %105 = vector.extract_strided_slice %103 {offsets = [0, 32], sizes = [1, 32], strides = [1, 1]} : vector<1x128xf32> to vector<1x32xf32>
    %106 = vector.extract_strided_slice %103 {offsets = [0, 64], sizes = [1, 32], strides = [1, 1]} : vector<1x128xf32> to vector<1x32xf32>
    %107 = vector.extract_strided_slice %103 {offsets = [0, 96], sizes = [1, 32], strides = [1, 1]} : vector<1x128xf32> to vector<1x32xf32>
    %108 = arith.mulf %105, %93 : vector<1x32xf32>
    %109 = arith.mulf %104, %106 : vector<1x32xf32>
    %110 = arith.addf %108, %109 : vector<1x32xf32>
    %111 = math.tanh %110 : vector<1x32xf32>
    %112 = arith.mulf %107, %111 : vector<1x32xf32>
    %113 = vector.extract_strided_slice %61 {offsets = [2, 0], sizes = [1, 128], strides = [1, 1]} : vector<8x128xf32> to vector<1x128xf32>
    %c0_58 = arith.constant 0 : index
    %c0_59 = arith.constant 0 : index
    %114 = vector.load %arg4[%c0_58, %c0_59] : memref<32x128xf32, #tpu.memory_space<vmem>>, vector<32x128xf32>
    %cst_60 = arith.constant dense<0.000000e+00> : vector<1x128xf32>
    %115 = tpu.matmul %112, %114, %cst_60 {dimension_numbers = #tpu.dot_dimension_numbers<[1], [0], [0], [1], [0, 0, 1, 1], [], []>} : vector<1x32xf32>, vector<32x128xf32>, vector<1x128xf32> -> vector<1x128xf32>
    %116 = arith.addf %113, %115 : vector<1x128xf32>
    %117 = arith.mulf %116, %70 : vector<1x128xf32>
    %118 = math.tanh %117 : vector<1x128xf32>
    %119 = arith.mulf %118, %73 : vector<1x128xf32>
    %120 = arith.addf %119, %76 : vector<1x128xf32>
    %121 = vector.extract_strided_slice %120 {offsets = [0, 0], sizes = [1, 32], strides = [1, 1]} : vector<1x128xf32> to vector<1x32xf32>
    %122 = vector.extract_strided_slice %120 {offsets = [0, 32], sizes = [1, 32], strides = [1, 1]} : vector<1x128xf32> to vector<1x32xf32>
    %123 = vector.extract_strided_slice %120 {offsets = [0, 64], sizes = [1, 32], strides = [1, 1]} : vector<1x128xf32> to vector<1x32xf32>
    %124 = vector.extract_strided_slice %120 {offsets = [0, 96], sizes = [1, 32], strides = [1, 1]} : vector<1x128xf32> to vector<1x32xf32>
    %125 = arith.mulf %122, %110 : vector<1x32xf32>
    %126 = arith.mulf %121, %123 : vector<1x32xf32>
    %127 = arith.addf %125, %126 : vector<1x32xf32>
    %128 = math.tanh %127 : vector<1x32xf32>
    %129 = arith.mulf %124, %128 : vector<1x32xf32>
    %130 = vector.extract_strided_slice %61 {offsets = [3, 0], sizes = [1, 128], strides = [1, 1]} : vector<8x128xf32> to vector<1x128xf32>
    %c0_61 = arith.constant 0 : index
    %c0_62 = arith.constant 0 : index
    %131 = vector.load %arg4[%c0_61, %c0_62] : memref<32x128xf32, #tpu.memory_space<vmem>>, vector<32x128xf32>
    %cst_63 = arith.constant dense<0.000000e+00> : vector<1x128xf32>
    %132 = tpu.matmul %129, %131, %cst_63 {dimension_numbers = #tpu.dot_dimension_numbers<[1], [0], [0], [1], [0, 0, 1, 1], [], []>} : vector<1x32xf32>, vector<32x128xf32>, vector<1x128xf32> -> vector<1x128xf32>
    %133 = arith.addf %130, %132 : vector<1x128xf32>
    %134 = arith.mulf %133, %70 : vector<1x128xf32>
    %135 = math.tanh %134 : vector<1x128xf32>
    %136 = arith.mulf %135, %73 : vector<1x128xf32>
    %137 = arith.addf %136, %76 : vector<1x128xf32>
    %138 = vector.extract_strided_slice %137 {offsets = [0, 0], sizes = [1, 32], strides = [1, 1]} : vector<1x128xf32> to vector<1x32xf32>
    %139 = vector.extract_strided_slice %137 {offsets = [0, 32], sizes = [1, 32], strides = [1, 1]} : vector<1x128xf32> to vector<1x32xf32>
    %140 = vector.extract_strided_slice %137 {offsets = [0, 64], sizes = [1, 32], strides = [1, 1]} : vector<1x128xf32> to vector<1x32xf32>
    %141 = vector.extract_strided_slice %137 {offsets = [0, 96], sizes = [1, 32], strides = [1, 1]} : vector<1x128xf32> to vector<1x32xf32>
    %142 = arith.mulf %139, %127 : vector<1x32xf32>
    %143 = arith.mulf %138, %140 : vector<1x32xf32>
    %144 = arith.addf %142, %143 : vector<1x32xf32>
    %145 = math.tanh %144 : vector<1x32xf32>
    %146 = arith.mulf %141, %145 : vector<1x32xf32>
    %147 = vector.extract_strided_slice %61 {offsets = [4, 0], sizes = [1, 128], strides = [1, 1]} : vector<8x128xf32> to vector<1x128xf32>
    %c0_64 = arith.constant 0 : index
    %c0_65 = arith.constant 0 : index
    %148 = vector.load %arg4[%c0_64, %c0_65] : memref<32x128xf32, #tpu.memory_space<vmem>>, vector<32x128xf32>
    %cst_66 = arith.constant dense<0.000000e+00> : vector<1x128xf32>
    %149 = tpu.matmul %146, %148, %cst_66 {dimension_numbers = #tpu.dot_dimension_numbers<[1], [0], [0], [1], [0, 0, 1, 1], [], []>} : vector<1x32xf32>, vector<32x128xf32>, vector<1x128xf32> -> vector<1x128xf32>
    %150 = arith.addf %147, %149 : vector<1x128xf32>
    %151 = arith.mulf %150, %70 : vector<1x128xf32>
    %152 = math.tanh %151 : vector<1x128xf32>
    %153 = arith.mulf %152, %73 : vector<1x128xf32>
    %154 = arith.addf %153, %76 : vector<1x128xf32>
    %155 = vector.extract_strided_slice %154 {offsets = [0, 0], sizes = [1, 32], strides = [1, 1]} : vector<1x128xf32> to vector<1x32xf32>
    %156 = vector.extract_strided_slice %154 {offsets = [0, 32], sizes = [1, 32], strides = [1, 1]} : vector<1x128xf32> to vector<1x32xf32>
    %157 = vector.extract_strided_slice %154 {offsets = [0, 64], sizes = [1, 32], strides = [1, 1]} : vector<1x128xf32> to vector<1x32xf32>
    %158 = vector.extract_strided_slice %154 {offsets = [0, 96], sizes = [1, 32], strides = [1, 1]} : vector<1x128xf32> to vector<1x32xf32>
    %159 = arith.mulf %156, %144 : vector<1x32xf32>
    %160 = arith.mulf %155, %157 : vector<1x32xf32>
    %161 = arith.addf %159, %160 : vector<1x32xf32>
    %162 = math.tanh %161 : vector<1x32xf32>
    %163 = arith.mulf %158, %162 : vector<1x32xf32>
    %164 = vector.extract_strided_slice %61 {offsets = [5, 0], sizes = [1, 128], strides = [1, 1]} : vector<8x128xf32> to vector<1x128xf32>
    %c0_67 = arith.constant 0 : index
    %c0_68 = arith.constant 0 : index
    %165 = vector.load %arg4[%c0_67, %c0_68] : memref<32x128xf32, #tpu.memory_space<vmem>>, vector<32x128xf32>
    %cst_69 = arith.constant dense<0.000000e+00> : vector<1x128xf32>
    %166 = tpu.matmul %163, %165, %cst_69 {dimension_numbers = #tpu.dot_dimension_numbers<[1], [0], [0], [1], [0, 0, 1, 1], [], []>} : vector<1x32xf32>, vector<32x128xf32>, vector<1x128xf32> -> vector<1x128xf32>
    %167 = arith.addf %164, %166 : vector<1x128xf32>
    %168 = arith.mulf %167, %70 : vector<1x128xf32>
    %169 = math.tanh %168 : vector<1x128xf32>
    %170 = arith.mulf %169, %73 : vector<1x128xf32>
    %171 = arith.addf %170, %76 : vector<1x128xf32>
    %172 = vector.extract_strided_slice %171 {offsets = [0, 0], sizes = [1, 32], strides = [1, 1]} : vector<1x128xf32> to vector<1x32xf32>
    %173 = vector.extract_strided_slice %171 {offsets = [0, 32], sizes = [1, 32], strides = [1, 1]} : vector<1x128xf32> to vector<1x32xf32>
    %174 = vector.extract_strided_slice %171 {offsets = [0, 64], sizes = [1, 32], strides = [1, 1]} : vector<1x128xf32> to vector<1x32xf32>
    %175 = vector.extract_strided_slice %171 {offsets = [0, 96], sizes = [1, 32], strides = [1, 1]} : vector<1x128xf32> to vector<1x32xf32>
    %176 = arith.mulf %173, %161 : vector<1x32xf32>
    %177 = arith.mulf %172, %174 : vector<1x32xf32>
    %178 = arith.addf %176, %177 : vector<1x32xf32>
    %179 = math.tanh %178 : vector<1x32xf32>
    %180 = arith.mulf %175, %179 : vector<1x32xf32>
    %181 = vector.extract_strided_slice %61 {offsets = [6, 0], sizes = [1, 128], strides = [1, 1]} : vector<8x128xf32> to vector<1x128xf32>
    %c0_70 = arith.constant 0 : index
    %c0_71 = arith.constant 0 : index
    %182 = vector.load %arg4[%c0_70, %c0_71] : memref<32x128xf32, #tpu.memory_space<vmem>>, vector<32x128xf32>
    %cst_72 = arith.constant dense<0.000000e+00> : vector<1x128xf32>
    %183 = tpu.matmul %180, %182, %cst_72 {dimension_numbers = #tpu.dot_dimension_numbers<[1], [0], [0], [1], [0, 0, 1, 1], [], []>} : vector<1x32xf32>, vector<32x128xf32>, vector<1x128xf32> -> vector<1x128xf32>
    %184 = arith.addf %181, %183 : vector<1x128xf32>
    %185 = arith.mulf %184, %70 : vector<1x128xf32>
    %186 = math.tanh %185 : vector<1x128xf32>
    %187 = arith.mulf %186, %73 : vector<1x128xf32>
    %188 = arith.addf %187, %76 : vector<1x128xf32>
    %189 = vector.extract_strided_slice %188 {offsets = [0, 0], sizes = [1, 32], strides = [1, 1]} : vector<1x128xf32> to vector<1x32xf32>
    %190 = vector.extract_strided_slice %188 {offsets = [0, 32], sizes = [1, 32], strides = [1, 1]} : vector<1x128xf32> to vector<1x32xf32>
    %191 = vector.extract_strided_slice %188 {offsets = [0, 64], sizes = [1, 32], strides = [1, 1]} : vector<1x128xf32> to vector<1x32xf32>
    %192 = vector.extract_strided_slice %188 {offsets = [0, 96], sizes = [1, 32], strides = [1, 1]} : vector<1x128xf32> to vector<1x32xf32>
    %193 = arith.mulf %190, %178 : vector<1x32xf32>
    %194 = arith.mulf %189, %191 : vector<1x32xf32>
    %195 = arith.addf %193, %194 : vector<1x32xf32>
    %196 = math.tanh %195 : vector<1x32xf32>
    %197 = arith.mulf %192, %196 : vector<1x32xf32>
    %198 = vector.extract_strided_slice %61 {offsets = [7, 0], sizes = [1, 128], strides = [1, 1]} : vector<8x128xf32> to vector<1x128xf32>
    %c0_73 = arith.constant 0 : index
    %c0_74 = arith.constant 0 : index
    %199 = vector.load %arg4[%c0_73, %c0_74] : memref<32x128xf32, #tpu.memory_space<vmem>>, vector<32x128xf32>
    %cst_75 = arith.constant dense<0.000000e+00> : vector<1x128xf32>
    %200 = tpu.matmul %197, %199, %cst_75 {dimension_numbers = #tpu.dot_dimension_numbers<[1], [0], [0], [1], [0, 0, 1, 1], [], []>} : vector<1x32xf32>, vector<32x128xf32>, vector<1x128xf32> -> vector<1x128xf32>
    %201 = arith.addf %198, %200 : vector<1x128xf32>
    %202 = arith.mulf %201, %70 : vector<1x128xf32>
    %203 = math.tanh %202 : vector<1x128xf32>
    %204 = arith.mulf %203, %73 : vector<1x128xf32>
    %205 = arith.addf %204, %76 : vector<1x128xf32>
    %206 = vector.extract_strided_slice %205 {offsets = [0, 0], sizes = [1, 32], strides = [1, 1]} : vector<1x128xf32> to vector<1x32xf32>
    %207 = vector.extract_strided_slice %205 {offsets = [0, 32], sizes = [1, 32], strides = [1, 1]} : vector<1x128xf32> to vector<1x32xf32>
    %208 = vector.extract_strided_slice %205 {offsets = [0, 64], sizes = [1, 32], strides = [1, 1]} : vector<1x128xf32> to vector<1x32xf32>
    %209 = vector.extract_strided_slice %205 {offsets = [0, 96], sizes = [1, 32], strides = [1, 1]} : vector<1x128xf32> to vector<1x32xf32>
    %210 = arith.mulf %207, %195 : vector<1x32xf32>
    %211 = arith.mulf %206, %208 : vector<1x32xf32>
    %212 = arith.addf %210, %211 : vector<1x32xf32>
    %213 = math.tanh %212 : vector<1x32xf32>
    %214 = arith.mulf %209, %213 : vector<1x32xf32>
    %c0_76 = arith.constant 0 : index
    %c0_77 = arith.constant 0 : index
    %215 = vector.load %arg6[%c0_76, %c0_77] : memref<32x4xf32, #tpu.memory_space<vmem>>, vector<32x4xf32>
    %cst_78 = arith.constant dense<0.000000e+00> : vector<1x4xf32>
    %216 = tpu.matmul %214, %215, %cst_78 {dimension_numbers = #tpu.dot_dimension_numbers<[1], [0], [0], [1], [0, 0, 1, 1], [], []>} : vector<1x32xf32>, vector<32x4xf32>, vector<1x4xf32> -> vector<1x4xf32>
    %c0_79 = arith.constant 0 : index
    %c0_80 = arith.constant 0 : index
    %217 = vector.load %arg7[%c0_79, %c0_80] : memref<1x4xf32, #tpu.memory_space<vmem>>, vector<1x4xf32>
    %218 = arith.addf %216, %217 : vector<1x4xf32>
    %cst_81 = arith.constant dense<0xFF800000> : vector<1xf32>
    %219 = vector.multi_reduction <maximumf>, %218, %cst_81 [1] : vector<1x4xf32> to vector<1xf32>
    %220 = vector.shape_cast %219 : vector<1xf32> to vector<1x1xf32>
    %221 = vector.broadcast %220 : vector<1x1xf32> to vector<1x4xf32>
    %222 = arith.subf %218, %221 : vector<1x4xf32>
    %223 = math.exp %222 : vector<1x4xf32>
    %cst_82 = arith.constant dense<0.000000e+00> : vector<1xf32>
    %224 = vector.multi_reduction <add>, %223, %cst_82 [1] : vector<1x4xf32> to vector<1xf32>
    %225 = vector.shape_cast %224 : vector<1xf32> to vector<1x1xf32>
    %226 = math.log %225 : vector<1x1xf32>
    %227 = vector.broadcast %226 : vector<1x1xf32> to vector<1x4xf32>
    %228 = arith.subf %222, %227 : vector<1x4xf32>
    %229 = vector.shape_cast %228 : vector<1x4xf32> to vector<1x1x4xf32>
    %c0_83 = arith.constant 0 : index
    %c0_84 = arith.constant 0 : index
    %c0_85 = arith.constant 0 : index
    %230 = vector.load %arg8[%c0_83, %c0_84, %c0_85] : memref<1x1x4xf32, #tpu.memory_space<vmem>>, vector<1x1x4xf32>
    tpu.vector_store %arg8[%c0_83, %c0_84, %c0_85], %229 {strides = array<i32>} : memref<1x1x4xf32, #tpu.memory_space<vmem>>, vector<1x1x4xf32>,
    return
  }
  func.func @transform_0(%arg0: i32, %arg1: memref<4x8xi32, #tpu.memory_space<smem>>) -> (i32, i32) {
    %c0_i32 = arith.constant 0 : i32
    %c0_i32_0 = arith.constant 0 : i32
    %c0_i32_1 = arith.constant 0 : i32
    return %c0_i32, %c0_i32_0 : i32, i32
  }
  func.func @transform_1(%arg0: i32, %arg1: memref<4x8xi32, #tpu.memory_space<smem>>) -> (i32, i32) {
    %c0_i32 = arith.constant 0 : i32
    %c0_i32_0 = arith.constant 0 : i32
    %c0_i32_1 = arith.constant 0 : i32
    return %c0_i32, %c0_i32_0 : i32, i32
  }
  func.func @transform_2(%arg0: i32, %arg1: memref<4x8xi32, #tpu.memory_space<smem>>) -> (i32, i32) {
    %c0_i32 = arith.constant 0 : i32
    %c0_i32_0 = arith.constant 0 : i32
    %c0_i32_1 = arith.constant 0 : i32
    return %c0_i32, %c0_i32_0 : i32, i32
  }
  func.func @transform_3(%arg0: i32, %arg1: memref<4x8xi32, #tpu.memory_space<smem>>) -> (i32, i32) {
    %c0_i32 = arith.constant 0 : i32
    %c0_i32_0 = arith.constant 0 : i32
    %c0_i32_1 = arith.constant 0 : i32
    return %c0_i32, %c0_i32_0 : i32, i32
  }
  func.func @transform_4(%arg0: i32, %arg1: memref<4x8xi32, #tpu.memory_space<smem>>) -> (i32, i32) {
    %c0_i32 = arith.constant 0 : i32
    %c0_i32_0 = arith.constant 0 : i32
    %c0_i32_1 = arith.constant 0 : i32
    return %c0_i32, %c0_i32_0 : i32, i32
  }
  func.func @transform_5(%arg0: i32, %arg1: memref<4x8xi32, #tpu.memory_space<smem>>) -> (i32, i32) {
    %c0_i32 = arith.constant 0 : i32
    %c0_i32_0 = arith.constant 0 : i32
    %c0_i32_1 = arith.constant 0 : i32
    return %c0_i32, %c0_i32_0 : i32, i32
  }
  func.func @transform_6(%arg0: i32, %arg1: memref<4x8xi32, #tpu.memory_space<smem>>) -> (i32, i32, i32) {
    %c0_i32 = arith.constant 0 : i32
    %c0_i32_0 = arith.constant 0 : i32
    %c0_i32_1 = arith.constant 0 : i32
    return %arg0, %c0_i32, %c0_i32_0 : i32, i32, i32
  }
}

</mosaic_0001>

<bundles_post_ra>
// kernel: lstm_tagger_forward.1
= control target key start
LH: loop header
LB: loop body
LE: loop exit
PB: predicated region body
PF: predicated region fallthrough
CT: control target
= control target key end

     0   :  { %s2223_s0 = inlined_call_operand.vmem [shape: s32[4,8], index: 0, kind: input, shape index: {}]   ;;  %s2224_s1 = inlined_call_operand.vmem [shape: f32[50,16], index: 1, kind: input, shape index: {}]   ;;  %s2225_s2 = inlined_call_operand.vmem [shape: f32[16,128], index: 2, kind: input, shape index: {}]   ;;  %s2226_s3 = inlined_call_operand.vmem [shape: f32[32,128], index: 3, kind: input, shape index: {}]   ;;  %s2227_s4 = inlined_call_operand.vmem [shape: f32[1,128], index: 4, kind: input, shape index: {}]   ;;  %s2228_s5 = inlined_call_operand.vmem [shape: f32[32,4], index: 5, kind: input, shape index: {}]   ;;  %s2229_s6 = inlined_call_operand.vmem [shape: f32[1,4], index: 6, kind: input, shape index: {}]   ;;  %s2230_s7 = inlined_call_operand.hbm [shape: f32[4,1,4], index: 7, kind: output, shape index: {}]  }
   0x1   :  { %s12_s26 = sshll.u32 %s2223_s0, 4  ;;  %s13_s26 = int_to_ptr.vmem [resolvable:$true] %s12_s26 }
   0x2   :  { %s1752_s27 = scalar_lea.vmem %s13_s26, 64  ;;  %p1757_p1 = scmp.lt.s32.totalorder %s13_s26, %s13_s26 }
   0x3   :  { %p1753_p0 = scmp.ne.s32.totalorder %s13_s26, %s1752_s27  ;;  %p1758_p2 = scmp.lt.s32.totalorder %s1752_s27, %s1752_s27 }
   0x5   :  { %p1759_p3 = por %p1758_p2, %p1757_p1 }
   0x7   :  { %p1760_p4 = pnand %p1759_p3, %p1753_p0 }
   0x9   :  { %1763 = shalt.err (!%p1760_p4)  }
   0xa   :  { %s1830_s28 = smov [#allocation4]  }
   0xb   :  { %15 = dma.vmem_to_smem %s13_s26, 64, %s1830_s28, [#allocation3] }
   0xc   :  { %1808 = dma.done.wait [#allocation3], 64 }
   0xd   :  { %1809 = vsyncadd [#allocation3], 4294967232 }
   0xe   :  { %17 = sfence }
   0xf   :  { %18 = vsyncpa [#allocation6], 0 }
  0x10   :  { %20 = vsyncpa [#allocation6 + $0x1], 0  ;;  %s1881_s29 = smov 0   ;;  %s1883_s30 = smov 0  }
  0x11   :  { %s1885_s0 = smov 0   ;;  %s1887_s8 = smov 0  }
  0x12 LB: > { %s1902_s9 = sadd.s32 4294967295, %s1828_s8   ;;  %s1386_s10 = sadd.s32 4294967294, %s1828_s8   ;;  %s1828_s8 = sphi %s1887_s8, %s2236_s8   ;;  %s1824_s0 = sphi %s1885_s0, %s2235_s0   ;;  %s1820_s30 = sphi %s1883_s30, %s2234_s30   ;;  %s1816_s29 = sphi %s1881_s29, %s2233_s29  }
  0x13   : > { %s1906_s11 = sadd.s32 1, %s1828_s8   ;;  %s159_s12 = sadd.s32 1, %s1824_s0 }
  0x14   : > { %s156_s13 = ssub.s32 %s1828_s8, %s1906_s11  ;;  %p169_p5 = scmp.ne.s32.totalorder %s1824_s0, %s1820_s30 }
  0x15   : > { %p157_p6 = scmp.eq.s32.totalorder %s156_s13, 0  ;;  %p170_p7 = scmp.eq.s32.totalorder %s1902_s9, 3 }
  0x16   : > { %p175_p8 = scmp.ne.s32.totalorder %s1820_s30, %s1816_s29  ;;  %p176_p9 = scmp.eq.s32.totalorder %s1386_s10, 3 }
  0x17   : > { %s1917_s14 = scalar_select %p157_p6, %s1824_s0, %s159_s12  }
  0x18   : > { %p1919_p10 = por %p170_p7, %p169_p5  ;;  %p1923_p11 = por %p176_p9, %p175_p8 }
  0x19   : > { %p1388_p12 = scmp.ge.s32.totalorder %s1828_s8, 1  ;;  %p212_p13 = scmp.lt.s32.totalorder %s1828_s8, 5 }
  0x1b   : > { %p213_p0 = pnand %p1388_p12, %p212_p13 }
  0x1c   : > { %v400_v0 = vld [vmem:[%s2226_s3] sm:$0xff] (!%p213_p0)  ;;  %v401_v1 = vld [vmem:[%s2226_s3 + $0x8] sm:$0xff] (!%p213_p0)  ;;  %v1831_v3 = vmov (!%p213_p0), 0.0|0.0   ;;  %v402_v6 = vld [vmem:[%s2226_s3 + $0x10] sm:$0xff] (!%p213_p0)  ;;  %s1952_s10 = sshll.u32 (!%p213_p0), %s1902_s9, 7  ;;  %vm1832_vm0 = vmmov (!%p213_p0), 0   ;;  %v393_v22 = vlaneseq (!%p213_p0) }
  0x1d   : > { %216 = sbr.rel (%p213_p0) target bundleno = 6310 (0x18a6), region = 44  ;;  %v310_v2 = vld [vmem:[%s2225_s2] sm:$0xff] (!%p213_p0)  ;;  %1616 = vmatprep.subr.bf16.mxu1 (!%p213_p0), %v1831_v3  ;;  %v1939_v4 = vpack.c.bf16 (!%p213_p0), %v401_v1, %v400_v0  ;;  %1613 = vmatprep.subr.bf16.mxu0 (!%p213_p0), %v1831_v3  ;;  %v311_v5 = vld [vmem:[%s2225_s2 + $0x8] sm:$0xff] (!%p213_p0)  ;;  %v403_v7 = vld [vmem:[%s2226_s3 + $0x18] sm:$0xff] (!%p213_p0)  ;;  %v1833_v9 = vmov (!%p213_p0), 0.0   ;;  %s1957_s12 = sld [smem:[#allocation4 + %s1952_s10]] (!%p213_p0) }
  0x1e   : > { %v1614_v8 = vpack.c.bf16 (!%p213_p0), %v311_v5, %v310_v2  ;;  %1511 = vmatprep.mubr.msk.f32.mxu0 (!%p213_p0), %vm1832_vm0, %v1833_v9  ;;  %s246_s13 = sadd.s32 (!%p213_p0), 1, %s1952_s10  ;;  %1522 = vmatprep.mubr.msk.f32.mxu1 (!%p213_p0), %vm1832_vm0, %v1833_v9  ;;  %v1963_v10 = vpack.c.bf16 (!%p213_p0), %v403_v7, %v402_v6  ;;  %s255_s18 = sadd.s32 (!%p213_p0), 2, %s1952_s10  ;;  %vm244_vm1 = vcmask (!%p213_p0), 122880   ;;  %vm319_vm2 = vcmask (!%p213_p0), 130048   ;;  %v1430_v24 = vld [vmem:[%s2227_s4] ss:$0 sm:$0xff] (!%p213_p0) }
  0x1f   : > { %1618 = vmatpush3.bf16.msra.mxu1 (!%p213_p0), %v1939_v4  ;;  %s247_s17 = sld [smem:[#allocation4 + %s246_s13]] (!%p213_p0)  ;;  %s264_s20 = sadd.s32 (!%p213_p0), 3, %s1952_s10  ;;  %v394_v23 = vand.u32 (!%p213_p0), 127, %v393_v22  ;;  %v1834_v28 = vmov (!%p213_p0), 0.5   ;;  %vm404_vm6 = vcmask (!%p213_p0), 261120   ;;  %vm1308_vm7 = vcmask (!%p213_p0), 24576  }
  0x20   : > { %1615 = vmatpush3.bf16.msra.mxu0 (!%p213_p0), %v1614_v8  ;;  %1619 = vmatprep.subr.bf16.mxu1 (!%p213_p0), %v1831_v3  ;;  %s1967_s19 = sld [smem:[#allocation4 + %s255_s18]] (!%p213_p0)  ;;  %s273_s22 = sadd.s32 (!%p213_p0), 4, %s1952_s10 }
  0x21   : > { %s1970_s21 = sld [smem:[#allocation4 + %s264_s20]] (!%p213_p0)  ;;  %1622 = vmatprep.subr.bf16.mxu0 (!%p213_p0), %v1831_v3  ;;  %s282_s24 = sadd.s32 (!%p213_p0), 5, %s1952_s10  ;;  %vm395_vm3 = vcmp.ge.s32.totalorder (!%p213_p0), %v394_v23, 64  ;;  %vm396_vm4 = vcmp.lt.s32.totalorder (!%p213_p0), %v394_v23, 96 }
  0x22   : > { %s1974_s23 = sld [smem:[#allocation4 + %s273_s22]] (!%p213_p0)  ;;  %s291_s26 = sadd.s32 (!%p213_p0), 6, %s1952_s10  ;;  %vm397_vm5 = vmand (!%p213_p0), %vm395_vm3, %vm396_vm4 }
  0x23   : > { %1621 = vmatpush3.bf16.msra.mxu1 (!%p213_p0), %v1963_v10  ;;  %s1978_s25 = sld [smem:[#allocation4 + %s282_s24]] (!%p213_p0)  ;;  %p238_p1 = scmp.gt.s32.totalorder (!%p213_p0), %s1957_s12, 0  ;;  %v2050_v29 = vsel (!%p213_p0), %vm397_vm5, 1.0, %v1834_v28  ;;  %v2054_v33 = vsel (!%p213_p0), %vm397_vm5, 0.0, %v1834_v28 }
  0x24   : > { %p1390_p2 = scmp.lt.s32.totalorder %s1957_s12, 49  ;;  %1628 = vmatprep.subr.bf16.mxu1 %v1831_v3 }
  0x25   : > { %p248_p3 = scmp.gt.s32.totalorder %s247_s17, 0  ;;  %p1395_p4 = scmp.lt.s32.totalorder %s247_s17, 49 }
  0x26   : > { %s2238_s12 = smov (!%p238_p1, %s1957_s12), 0  ;;  %1523 = vmatmul.mubr.f32.vlgmr.msra.gmra.mrb[0].mxu1 %v1833_v9  ;;  %p257_p5 = scmp.gt.s32.totalorder %s1967_s19, 0 }
  0x27   : > { %s2240_s17 = smov (!%p248_p3, %s247_s17), 0  ;;  %1630 = vmatpush3.bf16.msra.mxu1 %v1939_v4  ;;  %1544 = vmatprep.mubr.msk.f32.mxu1 %vm1832_vm0, %v1833_v9  ;;  %s2242_s12 = smov (!%p1390_p2, %s2238_s12), 49 }
  0x28   : > { %1631 = vmatprep.subr.bf16.mxu1 %v1831_v3  ;;  %s2244_s17 = smov (!%p1395_p4, %s2240_s17), 49  ;;  %s242_s13 = scalar_lea.vmem %s2224_s1, %s2242_s12 }
  0x29   : > { %v243_v11 = vld [vmem:[%s242_s13] sm:$0x1]  ;;  %s252_s22 = scalar_lea.vmem %s2224_s1, %s2244_s17  ;;  %p1400_p6 = scmp.lt.s32.totalorder %s1967_s19, 49 }
  0x2a   : > { %245 = vst.msk [vmem:[#allocation2] sm:$0x1] %vm244_vm1, %v243_v11  ;;  %v253_v12 = vld [vmem:[%s252_s22] sm:$0x1]  ;;  %s2246_s19 = smov (!%p257_p5, %s1967_s19), 0  ;;  %p266_p7 = scmp.gt.s32.totalorder %s1970_s21, 0 }
  0x2b   : > { %1633 = vmatpush3.bf16.msra.mxu1 %v1963_v10  ;;  %254 = vst.msk [vmem:[#allocation2 + $0x1] sm:$0x1] %vm244_vm1, %v253_v12  ;;  %p1405_p8 = scmp.lt.s32.totalorder %s1970_s21, 49  ;;  %s2248_s19 = smov (!%p1400_p6, %s2246_s19), 49 }
  0x2c   : > { %1640 = vmatprep.subr.bf16.mxu1 %v1831_v3  ;;  %s2250_s21 = smov (!%p266_p7, %s1970_s21), 0  ;;  %s261_s24 = scalar_lea.vmem %s2224_s1, %s2248_s19 }
  0x2d   : > { %p275_p9 = scmp.gt.s32.totalorder %s1974_s23, 0  ;;  %v262_v13 = vld [vmem:[%s261_s24] sm:$0x1]  ;;  %s2252_s21 = smov (!%p1405_p8, %s2250_s21), 49 }
  0x2e   : > { %263 = vst.msk [vmem:[#allocation2 + $0x2] sm:$0x1] %vm244_vm1, %v262_v13  ;;  %s270_s18 = scalar_lea.vmem %s2224_s1, %s2252_s21  ;;  %p1410_p12 = scmp.lt.s32.totalorder %s1974_s23, 49 }
  0x2f   : > { %s276_s27 = scalar_select %p275_p9, %s1974_s23, 0  ;;  %v271_v14 = vld [vmem:[%s270_s18] sm:$0x1] }
  0x30   : > { %p284_p13 = scmp.gt.s32.totalorder %s1978_s25, 0  ;;  %p1415_p0 = scmp.lt.s32.totalorder %s1978_s25, 49  ;;  %272 = vst.msk [vmem:[#allocation2 + $0x3] sm:$0x1] %vm244_vm1, %v271_v14 }
  0x31   : > { %s2254_s27 = smov (!%p1410_p12, %s276_s27), 49  ;;  %s292_s12 = sld [smem:[#allocation4 + %s291_s26]] }
  0x32   : > { %s2256_s25 = smov (!%p284_p13, %s1978_s25), 0  ;;  %s279_s22 = scalar_lea.vmem %s2224_s1, %s2254_s27 }
  0x33   : > { %v280_v15 = vld [vmem:[%s279_s22] sm:$0x1]  ;;  %s2258_s25 = smov (!%p1415_p0, %s2256_s25), 49  ;;  %s300_s17 = sadd.s32 7, %s1952_s10 }
  0x34   : > { %281 = vst.msk [vmem:[#allocation2 + $0x4] sm:$0x1] %vm244_vm1, %v280_v15  ;;  %s288_s24 = scalar_lea.vmem %s2224_s1, %s2258_s25  ;;  %s301_s28 = sld [smem:[#allocation4 + %s300_s17]] }
  0x35   : > { %v289_v16 = vld [vmem:[%s288_s24] sm:$0x1]  ;;  %s1835_s22 = smov 64   ;;  %s1440_s19 = sshll.u32 %s1902_s9, 4 }
  0x36   : > { %290 = vst.msk [vmem:[#allocation2 + $0x5] sm:$0x1] %vm244_vm1, %v289_v16  ;;  %s2180_s21 = scalar_lea.hbm %s2230_s7, %s1440_s19  ;;  %s1837_s9 = smov [#allocation5]  }
  0x37   : > { %p293_p1 = scmp.gt.s32.totalorder %s292_s12, 0  ;;  %p1420_p2 = scmp.lt.s32.totalorder %s292_s12, 49 }
  0x39   : > { %s2260_s12 = smov (!%p293_p1, %s292_s12), 0 }
  0x3a   : > { %p302_p3 = scmp.gt.s32.totalorder %s301_s28, 0  ;;  %p1425_p4 = scmp.lt.s32.totalorder %s301_s28, 49 }
  0x3b   : > { %s2262_s12 = smov (!%p1420_p2, %s2260_s12), 49 }
  0x3c   : > { %s2264_s28 = smov (!%p302_p3, %s301_s28), 0  ;;  %s297_s13 = scalar_lea.vmem %s2224_s1, %s2262_s12 }
  0x3d   : > { %v298_v17 = vld [vmem:[%s297_s13] sm:$0x1]  ;;  %s2266_s28 = smov (!%p1425_p4, %s2264_s28), 49  ;;  %s1836_s12 = smov 32  }
  0x3e   : > { %299 = vst.msk [vmem:[#allocation2 + $0x6] sm:$0x1] %vm244_vm1, %v298_v17  ;;  %s306_s18 = scalar_lea.vmem %s2224_s1, %s2266_s28  ;;  %s1768_s28 = sshll.u32 %s1837_s9, 4  ;;  %s1769_s28 = int_to_ptr.vmem [resolvable:$false] %s1768_s28 }
  0x3f   : > { %v307_v18 = vld [vmem:[%s306_s18] sm:$0x1]  ;;  %s234_s18 = sand.u32 1, %s1820_s30   ;;  %s1770_s26 = scalar_lea.vmem %s1769_s28, 32 }
  0x40   : > { %308 = vst.msk [vmem:[#allocation2 + $0x7] sm:$0x1] %vm244_vm1, %v307_v18  ;;  %s235_s20 = scalar_lea.vmem [#allocation5], %s234_s18  ;;  %s1323_s23 = scalar_lea.sflag [#allocation6], %s234_s18 }
  0x47   : > { %v309_v19 = vld [vmem:[#allocation2] sm:$0xff] }
  0x48   : > { %1512 = vmatmul.mubr.msk.f32.vlgmr.msra.gmra.mrb[0].mxu0 %vm319_vm2, %v309_v19 }
  0x49   : > { %1624 = vmatpush3.bf16.msra.mxu0 %v1939_v4  ;;  %1533 = vmatprep.mubr.msk.f32.mxu0 %vm1832_vm0, %v1833_v9 }
  0x4a   : > { %1625 = vmatprep.subr.bf16.mxu0 %v1831_v3 }
  0x4d   : > { %1627 = vmatpush3.bf16.msra.mxu0 %v1963_v10 }
  0x4e   : > { %1634 = vmatprep.subr.bf16.mxu0 %v1831_v3 }
  0xf9   : > { %v474_v20 = vpop.f32.mrb[0].mxu1 }
  0xfa   : > { %v1524_v21 = vpop.f32.mrb[1].mxu1 }
 0x11b   : > { %v389_v25 = vpop.f32.mrb[0].mxu0 }
 0x11c   : > { %v2048_v26 = vadd.f32 %v1430_v24, %v389_v25  ;;  %v1513_v27 = vpop.f32.mrb[1].mxu0 }
 0x11e   : > { %v478_v30 = vadd.f32 %v474_v20, %v2048_v26 }
 0x120   : > { %v479_v31 = vmul.f32 %v478_v30, %v2050_v29 }
 0x122   : > { %1716 = vtanh.f32 %v479_v31 }
 0x12c   : > { %v1717_v32 = vpop.eup %1716 }
 0x12d   : > { %v481_v34 = vmul.f32 %v1717_v32, %v2050_v29 }
 0x12f   : > { %v482_v35 = vadd.f32 %v481_v34, %v2054_v33 }
 0x131   : > { %485 = vrot.lane.b32.xlu0 %v482_v35, %s1835_s22  ;;  %v483_v38 = vmul.f32 0.0, %v482_v35 }
 0x1a3   : > { %v486_v36 = vpop.permute.xlu0 %485 }
 0x1a4   : > { %v488_v37 = vmul.f32 %v486_v36, %v482_v35 }
 0x1a6   : > { %490 = vrot.lane.b32.xlu0 %v488_v37, %s1836_s12 }
 0x218   : > { %v491_v39 = vpop.permute.xlu0 %490 }
 0x219   : > { %v493_v40 = vadd.f32 %v491_v39, %v483_v38 }
 0x21b   : > { %1718 = vtanh.f32 %v493_v40  ;;  %v584_v55 = vrot.slane %v493_v40, 7 }
 0x225   : > { %v1719_v41 = vpop.eup %1718 }
 0x226   : > { %496 = vrot.lane.b32.xlu1 %v1719_v41, %s1835_s22 }
 0x298   : > { %v497_v42 = vpop.permute.xlu1 %496 }
 0x299   : > { %v499_v43 = vmul.f32 %v497_v42, %v482_v35 }
 0x29b   : > { %501 = vrot.lane.b32.xlu1 %v499_v43, %s1836_s12 }
 0x30d   : > { %v502_v44 = vpop.permute.xlu1 %501 }
 0x30e   : > { %1534 = vmatmul.mubr.msk.f32.vlgmr.msra.gmra.mrb[2].mxu0 %vm404_vm6, %v502_v44 }
 0x30f   : > { %1636 = vmatpush3.bf16.msra.mxu0 %v1939_v4  ;;  %1555 = vmatprep.mubr.msk.f32.mxu0 %vm1832_vm0, %v1833_v9 }
 0x310   : > { %1637 = vmatprep.subr.bf16.mxu0 %v1831_v3 }
 0x313   : > { %1639 = vmatpush3.bf16.msra.mxu0 %v1963_v10 }
 0x314   : > { %1646 = vmatprep.subr.bf16.mxu0 %v1831_v3 }
 0x3e1   : > { %v571_v45 = vpop.f32.mrb[2].mxu0 }
 0x3e2   : > { %v576_v46 = vrot.slane %v571_v45, 7  ;;  %v1535_v47 = vpop.f32.mrb[3].mxu0 }
 0x3e4   : > { %v578_v48 = vadd.f32 %v576_v46, %v2048_v26 }
 0x3e6   : > { %v579_v49 = vmul.f32 %v578_v48, %v2050_v29 }
 0x3e8   : > { %1720 = vtanh.f32 %v579_v49 }
 0x3f2   : > { %v1721_v50 = vpop.eup %1720 }
 0x3f3   : > { %v581_v51 = vmul.f32 %v1721_v50, %v2050_v29 }
 0x3f5   : > { %v582_v52 = vadd.f32 %v581_v51, %v2054_v33 }
 0x3f7   : > { %588 = vrot.lane.b32.xlu0 %v582_v52, %s1835_s22  ;;  %v586_v56 = vmul.f32 %v584_v55, %v582_v52 }
 0x469   : > { %v589_v53 = vpop.permute.xlu0 %588 }
 0x46a   : > { %v591_v54 = vmul.f32 %v589_v53, %v582_v52 }
 0x46c   : > { %593 = vrot.lane.b32.xlu1 %v591_v54, %s1836_s12 }
 0x4de   : > { %v594_v57 = vpop.permute.xlu1 %593 }
 0x4df   : > { %v596_v58 = vadd.f32 %v594_v57, %v586_v56 }
 0x4e1   : > { %1722 = vtanh.f32 %v596_v58  ;;  %v688_v14 = vrot.slane %v596_v58, 7 }
 0x4eb   : > { %v1723_v59 = vpop.eup %1722 }
 0x4ec   : > { %599 = vrot.lane.b32.xlu0 %v1723_v59, %s1835_s22 }
 0x55e   : > { %v600_v60 = vpop.permute.xlu0 %599 }
 0x55f   : > { %v602_v61 = vmul.f32 %v600_v60, %v582_v52 }
 0x561   : > { %v604_v62 = vrot.slane %v602_v61, 1 }
 0x563   : > { %605 = vrot.lane.b32.xlu1 %v604_v62, %s1836_s12 }
 0x5d5   : > { %v606_v63 = vpop.permute.xlu1 %605 }
 0x5d6   : > { %1545 = vmatmul.mubr.msk.f32.vlgmr.msra.gmra.mrb[2].mxu1 %vm404_vm6, %v606_v63 }
 0x5d7   : > { %1642 = vmatpush3.bf16.msra.mxu1 %v1939_v4  ;;  %1566 = vmatprep.mubr.msk.f32.mxu1 %vm1832_vm0, %v1833_v9 }
 0x5d8   : > { %1643 = vmatprep.subr.bf16.mxu1 %v1831_v3 }
 0x5db   : > { %1645 = vmatpush3.bf16.msra.mxu1 %v1963_v10 }
 0x5dc   : > { %1652 = vmatprep.subr.bf16.mxu1 %v1831_v3 }
 0x6a9   : > { %v675_v0 = vpop.f32.mrb[2].mxu1 }
 0x6aa   : > { %v680_v1 = vrot.slane %v675_v0, 6  ;;  %v1546_v2 = vpop.f32.mrb[3].mxu1 }
 0x6ac   : > { %v682_v5 = vadd.f32 %v680_v1, %v2048_v26 }
 0x6ae   : > { %v683_v6 = vmul.f32 %v682_v5, %v2050_v29 }
 0x6b0   : > { %1724 = vtanh.f32 %v683_v6 }
 0x6ba   : > { %v1725_v7 = vpop.eup %1724 }
 0x6bb   : > { %v685_v8 = vmul.f32 %v1725_v7, %v2050_v29 }
 0x6bd   : > { %v686_v11 = vadd.f32 %v685_v8, %v2054_v33 }
 0x6bf   : > { %692 = vrot.lane.b32.xlu0 %v686_v11, %s1835_s22  ;;  %v690_v15 = vmul.f32 %v688_v14, %v686_v11 }
 0x731   : > { %v693_v12 = vpop.permute.xlu0 %692 }
 0x732   : > { %v695_v13 = vmul.f32 %v693_v12, %v686_v11 }
 0x734   : > { %697 = vrot.lane.b32.xlu1 %v695_v13, %s1836_s12 }
 0x7a6   : > { %v698_v16 = vpop.permute.xlu1 %697 }
 0x7a7   : > { %v700_v17 = vadd.f32 %v698_v16, %v690_v15 }
 0x7a9   : > { %1726 = vtanh.f32 %v700_v17  ;;  %v792_v36 = vrot.slane %v700_v17, 7 }
 0x7b3   : > { %v1727_v18 = vpop.eup %1726 }
 0x7b4   : > { %703 = vrot.lane.b32.xlu0 %v1727_v18, %s1835_s22 }
 0x826   : > { %v704_v19 = vpop.permute.xlu0 %703 }
 0x827   : > { %v706_v20 = vmul.f32 %v704_v19, %v686_v11 }
 0x829   : > { %v708_v21 = vrot.slane %v706_v20, 2 }
 0x82b   : > { %709 = vrot.lane.b32.xlu1 %v708_v21, %s1836_s12 }
 0x89d   : > { %v710_v22 = vpop.permute.xlu1 %709 }
 0x89e   : > { %1556 = vmatmul.mubr.msk.f32.vlgmr.msra.gmra.mrb[4].mxu0 %vm404_vm6, %v710_v22 }
 0x89f   : > { %1648 = vmatpush3.bf16.msra.mxu0 %v1939_v4  ;;  %1577 = vmatprep.mubr.msk.f32.mxu0 %vm1832_vm0, %v1833_v9 }
 0x8a0   : > { %1649 = vmatprep.subr.bf16.mxu0 %v1831_v3 }
 0x8a3   : > { %1651 = vmatpush3.bf16.msra.mxu0 %v1963_v10 }
 0x8a4   : > { %1658 = vmatprep.subr.bf16.mxu0 %v1831_v3 }
 0x971   : > { %v779_v23 = vpop.f32.mrb[4].mxu0 }
 0x972   : > { %v784_v24 = vrot.slane %v779_v23, 5  ;;  %v1557_v25 = vpop.f32.mrb[5].mxu0 }
 0x974   : > { %v786_v27 = vadd.f32 %v784_v24, %v2048_v26 }
 0x976   : > { %v787_v28 = vmul.f32 %v786_v27, %v2050_v29 }
 0x978   : > { %1728 = vtanh.f32 %v787_v28 }
 0x982   : > { %v1729_v30 = vpop.eup %1728 }
 0x983   : > { %v789_v31 = vmul.f32 %v1729_v30, %v2050_v29 }
 0x985   : > { %v790_v32 = vadd.f32 %v789_v31, %v2054_v33 }
 0x987   : > { %796 = vrot.lane.b32.xlu0 %v790_v32, %s1835_s22  ;;  %v794_v37 = vmul.f32 %v792_v36, %v790_v32 }
 0x9f9   : > { %v797_v34 = vpop.permute.xlu0 %796 }
 0x9fa   : > { %v799_v35 = vmul.f32 %v797_v34, %v790_v32 }
 0x9fc   : > { %801 = vrot.lane.b32.xlu1 %v799_v35, %s1836_s12 }
 0xa6e   : > { %v802_v38 = vpop.permute.xlu1 %801 }
 0xa6f   : > { %v804_v39 = vadd.f32 %v802_v38, %v794_v37 }
 0xa71   : > { %1730 = vtanh.f32 %v804_v39  ;;  %v896_v55 = vrot.slane %v804_v39, 7 }
 0xa7b   : > { %v1731_v40 = vpop.eup %1730 }
 0xa7c   : > { %807 = vrot.lane.b32.xlu0 %v1731_v40, %s1835_s22 }
 0xaee   : > { %v808_v41 = vpop.permute.xlu0 %807 }
 0xaef   : > { %v810_v42 = vmul.f32 %v808_v41, %v790_v32 }
 0xaf1   : > { %v812_v43 = vrot.slane %v810_v42, 3 }
 0xaf3   : > { %813 = vrot.lane.b32.xlu1 %v812_v43, %s1836_s12 }
 0xb65   : > { %v814_v44 = vpop.permute.xlu1 %813 }
 0xb66   : > { %1567 = vmatmul.mubr.msk.f32.vlgmr.msra.gmra.mrb[4].mxu1 %vm404_vm6, %v814_v44 }
 0xb67   : > { %1654 = vmatpush3.bf16.msra.mxu1 %v1939_v4  ;;  %1588 = vmatprep.mubr.msk.f32.mxu1 %vm1832_vm0, %v1833_v9 }
 0xb68   : > { %1655 = vmatprep.subr.bf16.mxu1 %v1831_v3 }
 0xb6b   : > { %1657 = vmatpush3.bf16.msra.mxu1 %v1963_v10 }
 0xb6c   : > { %1664 = vmatprep.subr.bf16.mxu1 %v1831_v3 }
 0xc39   : > { %v883_v45 = vpop.f32.mrb[4].mxu1 }
 0xc3a   : > { %v888_v46 = vrot.slane %v883_v45, 4  ;;  %v1568_v47 = vpop.f32.mrb[5].mxu1 }
 0xc3c   : > { %v890_v48 = vadd.f32 %v888_v46, %v2048_v26 }
 0xc3e   : > { %v891_v49 = vmul.f32 %v890_v48, %v2050_v29 }
 0xc40   : > { %1732 = vtanh.f32 %v891_v49 }
 0xc4a   : > { %v1733_v50 = vpop.eup %1732 }
 0xc4b   : > { %v893_v51 = vmul.f32 %v1733_v50, %v2050_v29 }
 0xc4d   : > { %v894_v52 = vadd.f32 %v893_v51, %v2054_v33 }
 0xc4f   : > { %900 = vrot.lane.b32.xlu0 %v894_v52, %s1835_s22  ;;  %v898_v56 = vmul.f32 %v896_v55, %v894_v52 }
 0xcc1   : > { %v901_v53 = vpop.permute.xlu0 %900 }
 0xcc2   : > { %v903_v54 = vmul.f32 %v901_v53, %v894_v52 }
 0xcc4   : > { %905 = vrot.lane.b32.xlu1 %v903_v54, %s1836_s12 }
 0xd36   : > { %v906_v57 = vpop.permute.xlu1 %905 }
 0xd37   : > { %v908_v58 = vadd.f32 %v906_v57, %v898_v56  ;;  %v1230_v57 = vld [vmem:[%s2228_s5 + $0x18] sm:$0xff] }
 0xd39   : > { %1734 = vtanh.f32 %v908_v58 }
 0xd43   : > { %v1735_v59 = vpop.eup %1734 }
 0xd44   : > { %911 = vrot.lane.b32.xlu0 %v1735_v59, %s1835_s22 }
 0xdb6   : > { %v912_v60 = vpop.permute.xlu0 %911 }
 0xdb7   : > { %v914_v61 = vmul.f32 %v912_v60, %v894_v52 }
 0xdb9   : > { %v916_v62 = vrot.slane %v914_v61, 4 }
 0xdbb   : > { %917 = vrot.lane.b32.xlu1 %v916_v62, %s1836_s12 }
 0xe2d   : > { %v918_v63 = vpop.permute.xlu1 %917 }
 0xe2e   : > { %1578 = vmatmul.mubr.msk.f32.vlgmr.msra.gmra.mrb[6].mxu0 %vm404_vm6, %v918_v63 }
 0xe2f   : > { %1660 = vmatpush3.bf16.msra.mxu0 %v1939_v4  ;;  %1599 = vmatprep.mubr.msk.f32.mxu0 %vm1832_vm0, %v1833_v9 }
 0xe30   : > { %1661 = vmatprep.subr.bf16.mxu0 %v1831_v3 }
 0xe33   : > { %1663 = vmatpush3.bf16.msra.mxu0 %v1963_v10  ;;  %v1000_v10 = vrot.slane %v908_v58, 7 }
 0xf01   : > { %v987_v0 = vpop.f32.mrb[6].mxu0 }
 0xf02   : > { %v992_v1 = vrot.slane %v987_v0, 3  ;;  %v1579_v2 = vpop.f32.mrb[7].mxu0  ;;  %v1231_v0 = vld [vmem:[%s2229_s6] sm:$0x1] }
 0xf04   : > { %v994_v5 = vadd.f32 %v992_v1, %v2048_v26 }
 0xf06   : > { %v995_v6 = vmul.f32 %v994_v5, %v2050_v29 }
 0xf08   : > { %1736 = vtanh.f32 %v995_v6 }
 0xf12   : > { %v1737_v7 = vpop.eup %1736 }
 0xf13   : > { %v997_v8 = vmul.f32 %v1737_v7, %v2050_v29 }
 0xf15   : > { %v998_v4 = vadd.f32 %v997_v8, %v2054_v33 }
 0xf17   : > { %1004 = vrot.lane.b32.xlu0 %v998_v4, %s1835_s22  ;;  %v1002_v13 = vmul.f32 %v1000_v10, %v998_v4 }
 0xf89   : > { %v1005_v11 = vpop.permute.xlu0 %1004 }
 0xf8a   : > { %v1007_v12 = vmul.f32 %v1005_v11, %v998_v4 }
 0xf8c   : > { %1009 = vrot.lane.b32.xlu1 %v1007_v12, %s1836_s12 }
 0xffe   : > { %v1010_v14 = vpop.permute.xlu1 %1009 }
 0xfff   : > { %v1012_v15 = vadd.f32 %v1010_v14, %v1002_v13 }
0x1001   : > { %1738 = vtanh.f32 %v1012_v15 }
0x100b   : > { %v1739_v16 = vpop.eup %1738 }
0x100c   : > { %1015 = vrot.lane.b32.xlu0 %v1739_v16, %s1835_s22 }
0x107e   : > { %v1016_v17 = vpop.permute.xlu0 %1015 }
0x107f   : > { %v1018_v18 = vmul.f32 %v1016_v17, %v998_v4 }
0x1081   : > { %v1020_v19 = vrot.slane %v1018_v18, 5 }
0x1083   : > { %1021 = vrot.lane.b32.xlu1 %v1020_v19, %s1836_s12 }
0x10f5   : > { %v1022_v20 = vpop.permute.xlu1 %1021 }
0x10f6   : > { %1589 = vmatmul.mubr.msk.f32.vlgmr.msra.gmra.mrb[6].mxu1 %vm404_vm6, %v1022_v20 }
0x10f7   : > { %1610 = vmatprep.mubr.msk.f32.mxu1 %vm1832_vm0, %v1833_v9  ;;  %v1104_v9 = vrot.slane %v1012_v15, 7 }
0x11c9   : > { %v1091_v21 = vpop.f32.mrb[6].mxu1 }
0x11ca   : > { %v1096_v22 = vrot.slane %v1091_v21, 2  ;;  %v1590_v23 = vpop.f32.mrb[7].mxu1 }
0x11cc   : > { %v1098_v24 = vadd.f32 %v1096_v22, %v2048_v26 }
0x11ce   : > { %v1099_v25 = vmul.f32 %v1098_v24, %v2050_v29 }
0x11d0   : > { %1740 = vtanh.f32 %v1099_v25 }
0x11da   : > { %v1741_v27 = vpop.eup %1740 }
0x11db   : > { %v1101_v28 = vmul.f32 %v1741_v27, %v2050_v29 }
0x11dd   : > { %v1102_v30 = vadd.f32 %v1101_v28, %v2054_v33 }
0x11df   : > { %1108 = vrot.lane.b32.xlu0 %v1102_v30, %s1835_s22  ;;  %v1106_v34 = vmul.f32 %v1104_v9, %v1102_v30 }
0x1251   : > { %v1109_v31 = vpop.permute.xlu0 %1108 }
0x1252   : > { %v1111_v32 = vmul.f32 %v1109_v31, %v1102_v30 }
0x1254   : > { %1113 = vrot.lane.b32.xlu1 %v1111_v32, %s1836_s12 }
0x12c6   : > { %v1114_v35 = vpop.permute.xlu1 %1113 }
0x12c7   : > { %v1116_v36 = vadd.f32 %v1114_v35, %v1106_v34 }
0x12c9   : > { %1742 = vtanh.f32 %v1116_v36  ;;  %v1208_v52 = vrot.slane %v1116_v36, 7 }
0x12d3   : > { %v1743_v37 = vpop.eup %1742 }
0x12d4   : > { %1119 = vrot.lane.b32.xlu0 %v1743_v37, %s1835_s22 }
0x1346   : > { %v1120_v38 = vpop.permute.xlu0 %1119 }
0x1347   : > { %v1122_v39 = vmul.f32 %v1120_v38, %v1102_v30 }
0x1349   : > { %v1124_v40 = vrot.slane %v1122_v39, 6 }
0x134b   : > { %1125 = vrot.lane.b32.xlu1 %v1124_v40, %s1836_s12 }
0x13bd   : > { %v1126_v41 = vpop.permute.xlu1 %1125 }
0x13be   : > { %1600 = vmatmul.mubr.msk.f32.vlgmr.msra.gmra.mrb[8].mxu0 %vm404_vm6, %v1126_v41 }
0x1491   : > { %v1195_v42 = vpop.f32.mrb[8].mxu0 }
0x1492   : > { %v1200_v43 = vrot.slane %v1195_v42, 1  ;;  %v1601_v44 = vpop.f32.mrb[9].mxu0 }
0x1494   : > { %v1202_v45 = vadd.f32 %v1200_v43, %v2048_v26  ;;  %v1227_v26 = vld [vmem:[%s2228_s5] sm:$0xff] }
0x1496   : > { %v1203_v46 = vmul.f32 %v1202_v45, %v2050_v29 }
0x1498   : > { %1744 = vtanh.f32 %v1203_v46 }
0x14a2   : > { %v1745_v47 = vpop.eup %1744 }
0x14a3   : > { %v1205_v48 = vmul.f32 %v1745_v47, %v2050_v29  ;;  %v1228_v29 = vld [vmem:[%s2228_s5 + $0x8] sm:$0xff] }
0x14a4   : > { %v1665_v56 = vpack.c.bf16 %v1228_v29, %v1227_v26 }
0x14a5   : > { %v1206_v49 = vadd.f32 %v1205_v48, %v2054_v33  ;;  %v1229_v33 = vld [vmem:[%s2228_s5 + $0x10] sm:$0xff] }
0x14a6   : > { %1666 = vmatpush3.bf16.msra.mxu1 %v1665_v56  ;;  %v1668_v58 = vpack.c.bf16 %v1230_v57, %v1229_v33 }
0x14a7   : > { %1212 = vrot.lane.b32.xlu0 %v1206_v49, %s1835_s22  ;;  %v1210_v53 = vmul.f32 %v1208_v52, %v1206_v49  ;;  %1667 = vmatprep.subr.bf16.mxu1 %v1831_v3 }
0x14aa   : > { %1669 = vmatpush3.bf16.msra.mxu1 %v1668_v58 }
0x1519   : > { %v1213_v50 = vpop.permute.xlu0 %1212 }
0x151a   : > { %v1215_v51 = vmul.f32 %v1213_v50, %v1206_v49 }
0x151c   : > { %1217 = vrot.lane.b32.xlu1 %v1215_v51, %s1836_s12 }
0x158e   : > { %v1218_v54 = vpop.permute.xlu1 %1217 }
0x158f   : > { %v1220_v55 = vadd.f32 %v1218_v54, %v1210_v53 }
0x1591   : > { %1746 = vtanh.f32 %v1220_v55 }
0x159b   : > { %v1747_v59 = vpop.eup %1746 }
0x159c   : > { %1223 = vrot.lane.b32.xlu0 %v1747_v59, %s1835_s22  ;;  %s1335_s22 = sshll.u32 %s235_s20, 4  ;;  %s2182_s22 = int_to_ptr.vmem [resolvable:$true] %s1335_s22 }
0x159d   : > { %s1764_s24 = scalar_lea.vmem %s2182_s22, 16  ;;  %p1771_p8 = scmp.lt.s32.totalorder %s2182_s22, %s1769_s28 }
0x159e   : > { %p1765_p5 = scmp.ne.s32.totalorder %s2182_s22, %s1764_s24  ;;  %p1772_p9 = scmp.lt.s32.totalorder %s1770_s26, %s1764_s24 }
0x15a0   : > { %p1766_p6 = pnand %p1765_p5, %p1919_p10  ;;  %p1773_p12 = por %p1772_p9, %p1771_p8 }
0x15a2   : > { %p1767_p7 = pneg %p1766_p6 }
0x15a4   : > { %p1774_p13 = pnand %p1773_p12, %p1767_p7 }
0x160e   : > { %v1224_v60 = vpop.permute.xlu0 %1223 }
0x160f   : > { %v1226_v61 = vmul.f32 %v1224_v60, %v1206_v49 }
0x1611   : > { %v1233_v62 = vrot.slane %v1226_v61, 7 }
0x1613   : > { %1234 = vrot.lane.b32.xlu1 %v1233_v62, %s1836_s12 }
0x1685   : > { %v1235_v63 = vpop.permute.xlu1 %1234 }
0x1686   : > { %1611 = vmatmul.mubr.msk.f32.vlgmr.msra.gmra.mrb[8].mxu1 %vm404_vm6, %v1235_v63 }
0x1759   : > { %v1304_v1 = vpop.f32.mrb[8].mxu1 }
0x175a   : > { %v1305_v3 = vadd.f32 %v1304_v1, %v1231_v0  ;;  %v1612_v2 = vpop.f32.mrb[9].mxu1 }
0x175c   : > { %v1309_v5 = vsel %vm1308_vm7, %v1305_v3, -inf }
0x175d   : > { %1310 = vmax.xlane.f32.xlu0 %v1309_v5 }
0x17ea   : > { %v1311_v6 = vpop.xlane.xlu0 %1310 }
0x17eb   : > { %v1312_v7 = vsub.f32 %v1305_v3, %v1311_v6 }
0x17ed   : > { %v1313_v8 = vmul.f32 1.442695, %v1312_v7 }
0x17ef   : > { %1748 = vpow2.f32 %v1313_v8 }
0x17f9   : > { %v1749_v4 = vpop.eup %1748 }
0x17fa   : > { %v1315_v11 = vsel %vm1308_vm7, %v1749_v4, 0.0 }
0x17fb   : > { %1316 = vadd.xlane.f32.xlu1 %v1315_v11 }
0x1888   : > { %v1317_v12 = vpop.xlane.xlu1 %1316 }
0x1889   : > { %1750 = vlog2.f32 %v1317_v12 }
0x1893   : > { %v1751_v10 = vpop.eup %1750 }
0x1894   : > { %v1319_v13 = vmul.f32 0.6931472, %v1751_v10 }
0x1896   : > { %v1320_v14 = vsub.f32 %v1312_v7, %v1319_v13 }
0x1898   : > { %1321 = vst.msk [vmem:[%s235_s20] sm:$0x1] %vm1308_vm7, %v1320_v14 }
0x1899   : > { %1777 = shalt.err (!%p1774_p13)
}
0x189a   : > { %s1778_s27 = scalar_lea.hbm %s2180_s21, 16  ;;  %s1782_s25 = scalar_lea.hbm %s2230_s7, 64 }
0x189b   : > { %p1779_p0 = scmp.ne.s32.totalorder %s2180_s21, %s1778_s27  ;;  %p1783_p3 = scmp.lt.u32.totalorder %s2180_s21, %s2230_s7 }
0x189c   : > { %p1784_p4 = scmp.lt.u32.totalorder %s1782_s25, %s1778_s27  ;;  %p1786_p6 = scmp.lt.u32.totalorder %s1778_s27, %s2180_s21 }
0x189d   : > { %p1780_p1 = pnand %p1779_p0, %p1919_p10 }
0x189e   : > { %p1785_p5 = por %p1784_p4, %p1783_p3 }
0x189f   : > { %p1781_p2 = pneg %p1780_p1 }
0x18a0   : > { %p1787_p7 = por %p1786_p6, %p1785_p5 }
0x18a2   : > { %p1788_p8 = pnand %p1787_p7, %p1781_p2 }
0x18a4   : > { %1791 = shalt.err (!%p1788_p8)
}
0x18a5   : > { %1670 = dma.vmem_to_hbm [thread:$0]  (%p1919_p10), %s2182_s22, 16, %s2180_s21, %s1323_s23  }
0x18a6 PF: > { %p1676_p9 = scmp.ge.s32.totalorder %s1828_s8, 2  ;;  %s1347_s20 = sand.u32 1, %s1816_s29  }
0x18a7   : > { %s1348_s12 = scalar_lea.sflag [#allocation6], %s1347_s20 }
0x18a8   : > { %p1673_p12 = pnand %p1676_p9, %p1923_p11 }
0x18aa   : > { %1811 = dma.done.wait (!%p1673_p12), %s1348_s12, 16  }
0x18ab   : > { %1813 = vsyncadd (!%p1673_p12), %s1348_s12, 4294967280  ;;  %p23_p13 = scmp.ge.s32.totalorder %s1906_s11, 6   ;;  %s2233_s29 = smov %s1820_s30 }
0x18ac   : > { %s2234_s30 = smov %s1824_s0  ;;  %s2235_s0 = smov %s1917_s14 }
0x18ad   : > { %s2236_s8 = smov %s1906_s11  ;;  %25 = sbr.rel (!%p23_p13) target bundleno = 18 (0x12), region = 84 }
0x18b4   :  { %1352 = vsyncpa [#allocation6], 1 }
0x18b5   :  { %1354 = vsyncpa [#allocation6 + $0x1], 1 }

</bundles_post_ra>
